<compile_context>
chip_gen: v7x
topology: tpu7x:2x2x1
jax: 0.10.0
libtpu: 0.0.40
codegen_flags: <defaults>
</compile_context>

<pallas_src>
import functools

import jax
import jax.numpy as jnp
from jax.experimental import pallas as pl
from jax.experimental.pallas import tpu as pltpu

_LANE = 128
_SUBLANE = 8
_TARGET_H_TILE = 256                      # target rows per H tile (multiple of 8)
_TARGET_W_TILE = 512                      # target lanes per W tile (multiple of 128)
_VMEM_LIMIT_BYTES = 48 * 1024 * 1024      # headroom below v7x's 64 MiB physical VMEM


# ---------------------------------------------------------------------------
# Host-side helpers.
# ---------------------------------------------------------------------------
def _round_up(x: int, m: int) -> int:
    return ((x + m - 1) // m) * m


def _cdiv(a: int, b: int) -> int:
    return -(-a // b)


def _tile_and_pad(total: int, target: int, unit: int):
    """Return (tile, padded_total): tile % unit == 0, padded_total % tile == 0,
    padding kept small (no blow-up to the next multiple of `target`)."""
    padded = _round_up(total, unit)
    if padded <= target:
        return padded, padded
    n = _cdiv(padded, target)
    tile = _round_up(_cdiv(padded, n), unit)
    return tile, tile * n


def _interp_weight_matrix(out_size, in_size, out_pad, *, scale=1.0, dtype=jnp.bfloat16):
    """(out_pad, in_size) 1-D linear-resize matrix matching
    F.interpolate(mode='bilinear', align_corners=False).  Rows >= out_size are zero
    (padding).  `scale` is folded into the weights (the resize is linear)."""
    ratio = in_size / out_size
    dst = jnp.arange(out_size, dtype=jnp.float32)
    src = jnp.maximum((dst + 0.5) * ratio - 0.5, 0.0)      # PyTorch clamps negative src to 0
    i0 = jnp.minimum(jnp.floor(src).astype(jnp.int32), in_size - 1)
    i1 = jnp.minimum(i0 + 1, in_size - 1)
    frac = src - i0.astype(jnp.float32)
    w = (jax.nn.one_hot(i0, in_size, dtype=jnp.float32) * (1.0 - frac)[:, None]
         + jax.nn.one_hot(i1, in_size, dtype=jnp.float32) * frac[:, None])
    if scale != 1.0:
        w = w * scale
    if out_pad > out_size:
        w = jnp.pad(w, ((0, out_pad - out_size), (0, 0)))
    return w.astype(dtype)


# ---------------------------------------------------------------------------
# Pallas kernel body (shared by refine and pure-resize paths).
# ---------------------------------------------------------------------------
def _bilinear_kernel(*refs, order, has_hi, epilogue_scale, cdt):
    if has_hi:
        x_ref, hi_ref, wh_ref, wwt_ref, o_ref = refs
    else:
        x_ref, wh_ref, wwt_ref, o_ref = refs
        hi_ref = None

    x = x_ref[0].astype(cdt)                                  # (H_in, W_in) in bf16
    if order == "h":
        # Height-first, output tiled along H: (TH,H_in)@(H_in,W_in) then @(W_in,W_pad).
        tmp = jnp.dot(wh_ref[...], x, preferred_element_type=jnp.float32)
        up = jnp.dot(tmp.astype(cdt), wwt_ref[...], preferred_element_type=jnp.float32)
    else:
        # Width-first, output tiled along W: (H_in,W_in)@(W_in,TW) then (H_pad,H_in)@...
        tmp = jnp.dot(x, wwt_ref[...], preferred_element_type=jnp.float32)
        up = jnp.dot(wh_ref[...], tmp.astype(cdt), preferred_element_type=jnp.float32)

    if hi_ref is not None:
        up = jnp.maximum(up + hi_ref[0], 0.0)                 # refine: relu(up + hi)
    if epilogue_scale != 1.0:
        up = up * epilogue_scale
    o_ref[0] = up.astype(o_ref.dtype)


# ---------------------------------------------------------------------------
# pallas_call builder.
# ---------------------------------------------------------------------------
def _separable_bilinear(x, out_hw, *, hi=None, weight_scale=1.0, epilogue_scale=1.0,
                        compute_dtype=jnp.bfloat16):
    """out = resize(x) * weight_scale                      (hi is None)
       out = relu(resize(x) + hi) * epilogue_scale         (hi given, refine path)"""
    B, H_in, W_in = map(int, x.shape)
    H_out, W_out = int(out_hw[0]), int(out_hw[1])
    if hi is not None:
        assert hi.shape == (B, H_out, W_out)

    # Choose matmul ordering by MAC count; tile the output along the matching axis so
    # that tiling introduces no redundant compute.
    macs_w_first = H_in * W_out * (W_in + H_out)
    macs_h_first = H_out * W_in * (H_in + W_out)
    order = "h" if macs_h_first < macs_w_first else "w"

    if order == "h":
        th, h_pad = _tile_and_pad(H_out, _TARGET_H_TILE, _SUBLANE)
        w_pad = _round_up(W_out, _LANE)
        tw = w_pad
    else:
        tw, w_pad = _tile_and_pad(W_out, _TARGET_W_TILE, _LANE)
        h_pad = _round_up(H_out, _SUBLANE)
        th = h_pad
    n_tiles = (h_pad // th) if order == "h" else (w_pad // tw)

    # Interpolation weights in bf16 (f32 construction, maxdisp folded into wh).
    wh = _interp_weight_matrix(H_out, H_in, h_pad, scale=weight_scale, dtype=compute_dtype)
    wwt = _interp_weight_matrix(W_out, W_in, w_pad, dtype=compute_dtype).T   # (W_in, w_pad)

    x_spec = pl.BlockSpec((1, H_in, W_in), lambda b, t: (b, 0, 0))
    if order == "h":
        tile_spec = pl.BlockSpec((1, th, w_pad), lambda b, t: (b, t, 0))
        wh_spec = pl.BlockSpec((th, H_in), lambda b, t: (t, 0))
        wwt_spec = pl.BlockSpec((W_in, w_pad), lambda b, t: (0, 0))
    else:
        tile_spec = pl.BlockSpec((1, h_pad, tw), lambda b, t: (b, 0, t))
        wh_spec = pl.BlockSpec((h_pad, H_in), lambda b, t: (0, 0))
        wwt_spec = pl.BlockSpec((W_in, tw), lambda b, t: (0, t))

    inputs = [x]
    in_specs = [x_spec]
    if hi is not None:
        hi_p = hi
        if (h_pad, w_pad) != (H_out, W_out):
            hi_p = jnp.pad(hi, ((0, 0), (0, h_pad - H_out), (0, w_pad - W_out)))
        inputs.append(hi_p)
        in_specs.append(tile_spec)
    inputs += [wh, wwt]
    in_specs += [wh_spec, wwt_spec]

    if order == "h":
        flops = 2 * B * h_pad * W_in * (H_in + w_pad)
    else:
        flops = 2 * B * H_in * w_pad * (W_in + h_pad)
    flops += 4 * B * h_pad * w_pad                             # epilogue add/relu/scale
    bytes_accessed = 4 * B * (H_in * W_in + h_pad * w_pad) + 2 * (wh.size + wwt.size)
    if hi is not None:
        bytes_accessed += 4 * B * h_pad * w_pad

    kernel = functools.partial(
        _bilinear_kernel, order=order, has_hi=hi is not None,
        epilogue_scale=float(epilogue_scale), cdt=compute_dtype)

    out = pl.pallas_call(
        kernel,
        out_shape=jax.ShapeDtypeStruct((B, h_pad, w_pad), x.dtype),
        grid_spec=pltpu.PrefetchScalarGridSpec(
            num_scalar_prefetch=0,
            grid=(B, n_tiles),
            in_specs=in_specs,
            out_specs=tile_spec,
        ),
        compiler_params=pltpu.CompilerParams(
            dimension_semantics=("parallel", "parallel"),
            vmem_limit_bytes=_VMEM_LIMIT_BYTES,
        ),
        cost_estimate=pl.CostEstimate(
            flops=int(flops), transcendentals=0, bytes_accessed=int(bytes_accessed)),
    )(*inputs)

    if (h_pad, w_pad) != (H_out, W_out):
        out = out[:, :H_out, :W_out]
    return out


def fused_refine(lo, hi, scale, *, compute_dtype=jnp.bfloat16):
    """relu(bilinear_up(lo, hi.shape) + hi) * scale, per batch element."""
    _, H_hi, W_hi = hi.shape
    return _separable_bilinear(lo, (H_hi, W_hi), hi=hi, epilogue_scale=scale,
                               compute_dtype=compute_dtype)


def resize_and_scale(x, out_hw, scale, *, compute_dtype=jnp.bfloat16):
    """bilinear_resize(x * scale, out_hw); the scale is folded into the resize weights."""
    return _separable_bilinear(x, out_hw, weight_scale=scale, compute_dtype=compute_dtype)


# ---------------------------------------------------------------------------
# Module-equivalent wrapper (no learnable parameters).
# ---------------------------------------------------------------------------
class StereoNetPostProcess:
    """JAX/Pallas port of hat StereoNetPostProcess."""

    def __init__(self, maxdisp: int = 192, training: bool = False,
                 compute_dtype=jnp.bfloat16):
        self.maxdisp = maxdisp
        self.training = training
        self.compute_dtype = compute_dtype   # set jnp.float32 for tighter numerical parity

    def __call__(self, pred_disps, gt_disps=None):
        pred_disps = list(pred_disps)                 # each: (B, 1, H, W) NCHW
        lo = pred_disps[-2][:, 0]                     # (B, H_lo, W_lo)
        hi = pred_disps[-1][:, 0]                     # (B, H_hi, W_hi)

        if self.training:
            assert gt_disps is not None
            # pred_disps[-1] = relu(upsample(pred_disps[-2]) + pred_disps[-1])
            refined = fused_refine(lo, hi, scale=1.0, compute_dtype=self.compute_dtype)
            pred_disps[-1] = refined[:, None]                   # back to NCHW
            gt_h, gt_w = int(gt_disps.shape[1]), int(gt_disps.shape[2])
            outs = []
            for p in pred_disps:
                # Reference module only compares widths before deciding to resize.
                if int(p.shape[-1]) != gt_w:
                    out = resize_and_scale(p[:, 0], (gt_h, gt_w), float(self.maxdisp),
                                           compute_dtype=self.compute_dtype)
                else:
                    out = p[:, 0] * float(self.maxdisp)         # trivial elementwise glue
                outs.append(out)                                 # squeeze(1) via [:, 0]
            return outs
        else:
            # relu(upsample(lo) + hi).squeeze(1) * maxdisp, fused in one kernel.
            return fused_refine(lo, hi, scale=float(self.maxdisp),
                                compute_dtype=self.compute_dtype)


# ---------------------------------------------------------------------------
# Pure-JAX references (f32) for sanity checks.
# ---------------------------------------------------------------------------
def _interp_matrix_f32(out_size, in_size):
    return _interp_weight_matrix(out_size, in_size, out_size, dtype=jnp.float32)


def _reference_refine(lo, hi, scale):
    wh = _interp_matrix_f32(hi.shape[1], lo.shape[1])
    wwt = _interp_matrix_f32(hi.shape[2], lo.shape[2]).T
    up = jnp.einsum("oh,bhw,wp->bop", wh, lo, wwt)
    return jnp.maximum(up + hi, 0.0) * scale


def _reference_resize(x, out_hw, scale):
    wh = _interp_matrix_f32(out_hw[0], x.shape[1])
    wwt = _interp_matrix_f32(out_hw[1], x.shape[2]).T
    return jnp.einsum("oh,bhw,wp->bop", wh, x * scale, wwt)


def _assert_close(got, want, name):
    err = float(jnp.max(jnp.abs(got - want)))
    tol = 0.02 * float(jnp.max(jnp.abs(want))) + 0.05     # bf16 MXU operands
    assert err <= tol, f"{name}: max abs err {err} > tol {tol}"


# ---------------------------------------------------------------------------
# Demo / smoke test.
# ---------------------------------------------------------------------------
if __name__ == "__main__":
    key = jax.random.PRNGKey(0)
    k1, k2, k3, k4, k5, k6 = jax.random.split(key, 6)
    B = 2
    # Multi-scale disparity predictions (NCHW, C=1), coarsest -> finest.
    pred_disps = [
        jax.random.uniform(k1, (B, 1, 4, 8), dtype=jnp.float32),
        jax.random.uniform(k2, (B, 1, 8, 16), dtype=jnp.float32),
        jax.random.uniform(k3, (B, 1, 16, 32), dtype=jnp.float32),
    ]
    gt_disps = jax.random.uniform(k4, (B, 16, 32), dtype=jnp.float32) * 192.0

    # Eval path (module in inference mode).
    post_eval = StereoNetPostProcess(maxdisp=192, training=False)
    out_eval = jax.block_until_ready(post_eval(list(pred_disps)))
    assert out_eval.shape == (B, 16, 32)
    _assert_close(out_eval,
                  _reference_refine(pred_disps[-2][:, 0], pred_disps[-1][:, 0], 192.0),
                  "eval")

    # Training path.
    post_train = StereoNetPostProcess(maxdisp=192, training=True)
    out_train = jax.block_until_ready(post_train(list(pred_disps), gt_disps))
    assert all(o.shape == (B, 16, 32) for o in out_train)
    _assert_close(out_train[0],
                  _reference_resize(pred_disps[0][:, 0], (16, 32), 192.0),
                  "train[0]")

    # Extra smoke tests: exercise both tiling orders with >1 spatial tile.
    xa = jax.random.uniform(k5, (B, 8, 16), dtype=jnp.float32)      # width-first, 2 W-tiles
    ya = jax.block_until_ready(resize_and_scale(xa, (16, 1024), 1.0))
    _assert_close(ya, _reference_resize(xa, (16, 1024), 1.0), "w-tiled")

    xb = jax.random.uniform(k6, (B, 16, 8), dtype=jnp.float32)      # height-first, 4 H-tiles
    yb = jax.block_until_ready(resize_and_scale(xb, (1024, 16), 1.0))
    _assert_close(yb, _reference_resize(xb, (1024, 16), 1.0), "h-tiled")

    print("KERNEL_OK")
</pallas_src>

<mosaic_0001>
module attributes {stable_mosaic.version = 11 : i64} {
  func.func @_bilinear_kernel(%arg0: i32, %arg1: i32, %arg2: memref<1x8x16xf32, #tpu.memory_space<vmem>>, %arg3: memref<1x16x128xf32, #tpu.memory_space<vmem>>, %arg4: memref<16x8xbf16, #tpu.memory_space<vmem>>, %arg5: memref<16x128xbf16, #tpu.memory_space<vmem>>, %arg6: memref<1x16x128xf32, #tpu.memory_space<vmem>>) attributes {dimension_semantics = [#tpu.dimension_semantics<parallel>, #tpu.dimension_semantics<parallel>], iteration_bounds = array<i64: 2, 1>, scalar_prefetch = 0 : i64, scratch_operands = 0 : i64, tpu.core_type = #tpu.core_type<tc>, window_params = [{transform_indices = @transform_0, window_bounds = array<i64: 1, 8, 16>}, {transform_indices = @transform_1, window_bounds = array<i64: 1, 16, 128>}, {pipeline_mode = #tpu.pipeline_mode<synchronous>, transform_indices = @transform_2, window_bounds = array<i64: 16, 8>}, {transform_indices = @transform_3, window_bounds = array<i64: 16, 128>}, {transform_indices = @transform_4, window_bounds = array<i64: 1, 16, 128>}]} {
    %c0 = arith.constant 0 : index
    %c0_0 = arith.constant 0 : index
    %c0_1 = arith.constant 0 : index
    %0 = vector.load %arg2[%c0, %c0_0, %c0_1] : memref<1x8x16xf32, #tpu.memory_space<vmem>>, vector<1x8x16xf32>
    %1 = vector.shape_cast %0 : vector<1x8x16xf32> to vector<8x16xf32>
    %2 = arith.truncf %1 : vector<8x16xf32> to vector<8x16xbf16>
    %c0_2 = arith.constant 0 : index
    %c0_3 = arith.constant 0 : index
    %3 = vector.load %arg5[%c0_2, %c0_3] : memref<16x128xbf16, #tpu.memory_space<vmem>>, vector<16x128xbf16>
    %cst = arith.constant dense<0.000000e+00> : vector<8x128xf32>
    %4 = tpu.matmul %2, %3, %cst {dimension_numbers = #tpu.dot_dimension_numbers<[1], [0], [0], [1], [0, 0, 1, 1], [], []>} : vector<8x16xbf16>, vector<16x128xbf16>, vector<8x128xf32> -> vector<8x128xf32>
    %c0_4 = arith.constant 0 : index
    %c0_5 = arith.constant 0 : index
    %5 = vector.load %arg4[%c0_4, %c0_5] : memref<16x8xbf16, #tpu.memory_space<vmem>>, vector<16x8xbf16>
    %6 = arith.truncf %4 : vector<8x128xf32> to vector<8x128xbf16>
    %cst_6 = arith.constant dense<0.000000e+00> : vector<16x128xf32>
    %7 = tpu.matmul %5, %6, %cst_6 {dimension_numbers = #tpu.dot_dimension_numbers<[1], [0], [0], [1], [0, 0, 1, 1], [], []>} : vector<16x8xbf16>, vector<8x128xbf16>, vector<16x128xf32> -> vector<16x128xf32>
    %c0_7 = arith.constant 0 : index
    %c0_8 = arith.constant 0 : index
    %c0_9 = arith.constant 0 : index
    %8 = vector.load %arg3[%c0_7, %c0_8, %c0_9] : memref<1x16x128xf32, #tpu.memory_space<vmem>>, vector<1x16x128xf32>
    %9 = vector.shape_cast %8 : vector<1x16x128xf32> to vector<16x128xf32>
    %10 = arith.addf %7, %9 : vector<16x128xf32>
    %cst_10 = arith.constant 0.000000e+00 : f32
    %11 = vector.broadcast %cst_10 : f32 to vector<16x128xf32>
    %12 = arith.maximumf %10, %11 : vector<16x128xf32>
    %cst_11 = arith.constant 1.920000e+02 : f32
    %13 = vector.broadcast %cst_11 : f32 to vector<16x128xf32>
    %14 = arith.mulf %12, %13 : vector<16x128xf32>
    %c0_12 = arith.constant 0 : index
    %c0_13 = arith.constant 0 : index
    %c0_14 = arith.constant 0 : index
    %15 = vector.load %arg6[%c0_12, %c0_13, %c0_14] : memref<1x16x128xf32, #tpu.memory_space<vmem>>, vector<1x16x128xf32>
    %16 = vector.shape_cast %15 : vector<1x16x128xf32> to vector<16x128xf32>
    %17 = vector.shape_cast %14 : vector<16x128xf32> to vector<1x16x128xf32>
    tpu.vector_store %arg6[%c0_12, %c0_13, %c0_14], %17 {strides = array<i32>} : memref<1x16x128xf32, #tpu.memory_space<vmem>>, vector<1x16x128xf32>,
    return
  }
  func.func @transform_0(%arg0: i32, %arg1: i32) -> (i32, i32, i32) {
    %c0_i32 = arith.constant 0 : i32
    %c0_i32_0 = arith.constant 0 : i32
    %c0_i32_1 = arith.constant 0 : i32
    return %arg0, %c0_i32, %c0_i32_0 : i32, i32, i32
  }
  func.func @transform_1(%arg0: i32, %arg1: i32) -> (i32, i32, i32) {
    %c0_i32 = arith.constant 0 : i32
    %c0_i32_0 = arith.constant 0 : i32
    return %arg0, %c0_i32, %arg1 : i32, i32, i32
  }
  func.func @transform_2(%arg0: i32, %arg1: i32) -> (i32, i32) {
    %c0_i32 = arith.constant 0 : i32
    %c0_i32_0 = arith.constant 0 : i32
    %c0_i32_1 = arith.constant 0 : i32
    return %c0_i32, %c0_i32_0 : i32, i32
  }
  func.func @transform_3(%arg0: i32, %arg1: i32) -> (i32, i32) {
    %c0_i32 = arith.constant 0 : i32
    %c0_i32_0 = arith.constant 0 : i32
    return %c0_i32, %arg1 : i32, i32
  }
  func.func @transform_4(%arg0: i32, %arg1: i32) -> (i32, i32, i32) {
    %c0_i32 = arith.constant 0 : i32
    %c0_i32_0 = arith.constant 0 : i32
    return %arg0, %c0_i32, %arg1 : i32, i32, i32
  }
}

</mosaic_0001>

<bundles_post_ra>
// kernel: tpu_custom_call.1
= control target key start
LH: loop header
LB: loop body
LE: loop exit
PB: predicated region body
PF: predicated region fallthrough
CT: control target
= control target key end

     0   :  { %9 = vsyncpa [#allocation3], 0  ;;  %s1078_s0 = inlined_call_operand.hbm [shape: f32[2,8,16], index: 0, kind: input, shape index: {}]   ;;  %s1079_s1 = inlined_call_operand.hbm [shape: f32[2,16,128], index: 1, kind: input, shape index: {}]   ;;  %s1080_s2 = inlined_call_operand.vmem [shape: bf16[16,8], index: 2, kind: input, shape index: {}]   ;;  %s1081_s3 = inlined_call_operand.vmem [shape: bf16[16,128], index: 3, kind: input, shape index: {}]   ;;  %s1082_s4 = inlined_call_operand.hbm [shape: f32[2,16,128], index: 4, kind: output, shape index: {}]  }
   0x1   :  { %11 = vsyncpa [#allocation3 + $0x1], 0 }
   0x2   :  { %12 = vsyncpa [#allocation6], 0 }
   0x3   :  { %14 = vsyncpa [#allocation6 + $0x1], 0 }
   0x4   :  { %15 = vsyncpa [#allocation4], 0 }
   0x5   :  { %17 = vsyncpa [#allocation4 + $0x1], 0  ;;  %s843_s15 = smov 0   ;;  %s845_s16 = smov 0  }
   0x6   :  { %s847_s17 = smov 0   ;;  %s849_s18 = smov 0  }
   0x7   :  { %s851_s19 = smov 0   ;;  %s853_s20 = smov 0  }
   0x8 LB: > { %s545_s21 = sadd.s32 4294967295, %s807_s20   ;;  %s546_s22 = sadd.s32 4294967294, %s807_s20   ;;  %s807_s20 = sphi %s853_s20, %s23_s20   ;;  %s803_s19 = sphi %s851_s19, %s1101_s19   ;;  %s799_s18 = sphi %s849_s18, %s1100_s18   ;;  %s795_s17 = sphi %s847_s17, %s1099_s17   ;;  %s791_s16 = sphi %s845_s16, %s1098_s16   ;;  %s787_s15 = sphi %s843_s15, %s1097_s15  }
   0x9   : > { %s35_s23 = sadd.s32 1, %s803_s19  ;;  %s42_s24 = sadd.s32 1, %s795_s17 }
   0xa   : > { %p37_p0 = scmp.ge.s32.totalorder %s35_s23, 2  ;;  %p49_p1 = scmp.ne.s32.totalorder %s795_s17, %s791_s16 }
   0xb   : > { %p50_p2 = scmp.eq.s32.totalorder %s807_s20, 0  ;;  %p55_p3 = scmp.ne.s32.totalorder %s791_s16, %s787_s15 }
   0xc   : > { %s1103_s23 = smov (%p37_p0, %s35_s23), 0  ;;  %p56_p5 = scmp.eq.s32.totalorder %s545_s21, 0 }
   0xd   : > { %p884_p4 = por %p50_p2, %p49_p1  ;;  %s39_s26 = ssub.s32 %s803_s19, %s1103_s23 }
   0xe   : > { %p156_p6 = scmp.eq.s32.totalorder %s545_s21, 1  ;;  %p40_p7 = scmp.eq.s32.totalorder %s39_s26, 0 }
   0xf   : > { %p890_p8 = por %p56_p5, %p55_p3  ;;  %p162_p10 = scmp.eq.s32.totalorder %s546_s22, 1 }
  0x10   : > { %p894_p9 = por %p156_p6, %p49_p1  ;;  %p603_p13 = scmp.lt.s32.totalorder %s807_s20, 2 }
  0x11   : > { %s1086_s27 = scalar_select %p890_p8, 1, 0 }
  0x12   : > { %s1087_s28 = scalar_select %p894_p9, 1, 0 }
  0x13   : > { %s899_s29 = scalar_select %p40_p7, %s795_s17, %s42_s24  }
  0x14   : > { %p901_p11 = por %p162_p10, %p55_p3  ;;  %s908_s5 = sand.u32 1, %s795_s17  }
  0x15   : > { %s550_s6 = sshll.u32 %s908_s5, 3  ;;  %s551_s7 = sshll.u32 %s803_s19, 7 }
  0x16   : > { %s1088_s30 = scalar_select %p901_p11, 1, 0 }
  0x17   : > { %s915_s10 = scalar_lea.hbm %s1078_s0, %s551_s7  ;;  %s196_s11 = scalar_lea.vmem [#allocation2], %s550_s6 }
  0x18   : > { %s203_s12 = sshll.u32 %s196_s11, 4  ;;  %p921_p0 = pnand %p603_p13, %p884_p4  ;;  %s917_s12 = int_to_ptr.vmem [resolvable:$true] %s203_s12 }
  0x19   : > { %s193_s14 = scalar_lea.sflag [#allocation3], %s908_s5  ;;  %s661_s21 = scalar_lea.hbm %s915_s10, 128 }
  0x1a   : > { %p662_p3 = scmp.ne.s32.totalorder %s915_s10, %s661_s21  ;;  %p663_p5 = pneg %p921_p0 }
  0x1b   : > { %s666_s25 = scalar_lea.hbm %s1078_s0, 256  ;;  %p667_p4 = scmp.lt.u32.totalorder %s915_s10, %s1078_s0 }
  0x1c   : > { %p664_p6 = pnand %p663_p5, %p662_p3  ;;  %p668_p10 = scmp.lt.u32.totalorder %s666_s25, %s661_s21 }
  0x1d   : > { %p670_p12 = scmp.lt.u32.totalorder %s661_s21, %s915_s10 }
  0x1e   : > { %p665_p7 = pneg %p664_p6  ;;  %p669_p13 = por %p668_p10, %p667_p4 }
  0x20   : > { %p671_p1 = por %p670_p12, %p669_p13 }
  0x22   : > { %p672_p2 = pnand %p671_p1, %p665_p7 }
  0x24   : > { %675 = shalt.err (!%p672_p2)
}
  0x25   : > { %s676_s7 = scalar_lea.vmem %s917_s12, 128  ;;  %s809_s8 = smov [#allocation2]  }
  0x26   : > { %p677_p3 = scmp.ne.s32.totalorder %s917_s12, %s676_s7  ;;  %s681_s9 = sshll.u32 %s809_s8, 4  ;;  %s682_s9 = int_to_ptr.vmem [resolvable:$false] %s681_s9 }
  0x27   : > { %s683_s11 = scalar_lea.vmem %s682_s9, 256  ;;  %p684_p9 = scmp.lt.s32.totalorder %s917_s12, %s682_s9 }
  0x28   : > { %p679_p6 = pnand %p677_p3, %p663_p5  ;;  %p685_p4 = scmp.lt.s32.totalorder %s683_s11, %s676_s7 }
  0x2a   : > { %p680_p11 = pneg %p679_p6  ;;  %p686_p10 = por %p685_p4, %p684_p9 }
  0x2c   : > { %p687_p12 = pnand %p686_p10, %p680_p11 }
  0x2e   : > { %690 = shalt.err (!%p687_p12)
}
  0x2f   : > { %595 = dma.hbm_to_vmem [thread:$0]  (!%p921_p0), %s915_s10, 128, %s917_s12, %s193_s14  }
  0x30   : > { %p1090_p1 = scmp.lt.s32.totalorder %s807_s20, 3  ;;  %p1091_p2 = scmp.ge.s32.totalorder %s807_s20, 1 }
  0x31   : > { %s552_s22 = sshll.u32 %s908_s5, 4  ;;  %s568_s24 = sshll.u32 %s803_s19, 8 }
  0x32   : > { %p957_p7 = pnand %p1091_p2, %p1090_p1  ;;  %s966_s6 = scalar_lea.hbm %s1079_s1, %s568_s24 }
  0x33   : > { %s214_s7 = scalar_lea.vmem [#allocation5], %s552_s22  ;;  %s211_s10 = scalar_lea.sflag [#allocation6], %s908_s5 }
  0x34   : > { %s222_s8 = sshll.u32 %s214_s7, 4  ;;  %s691_s12 = scalar_lea.hbm %s966_s6, 256  ;;  %s968_s8 = int_to_ptr.vmem [resolvable:$true] %s222_s8 }
  0x35   : > { %p692_p9 = scmp.ne.s32.totalorder %s966_s6, %s691_s12  ;;  %s696_s11 = scalar_lea.hbm %s1079_s1, 512 }
  0x36   : > { %p697_p3 = scmp.lt.u32.totalorder %s966_s6, %s1079_s1  ;;  %p698_p6 = scmp.lt.u32.totalorder %s696_s11, %s691_s12 }
  0x37   : > { %p694_p11 = pnand %p692_p9, %p663_p5  ;;  %p700_p10 = scmp.lt.u32.totalorder %s691_s12, %s966_s6 }
  0x38   : > { %p699_p4 = por %p698_p6, %p697_p3 }
  0x39   : > { %p695_p13 = pneg %p694_p11 }
  0x3a   : > { %p701_p12 = por %p700_p10, %p699_p4 }
  0x3c   : > { %p702_p1 = pnand %p701_p12, %p695_p13 }
  0x3e   : > { %705 = shalt.err (!%p702_p1)
}
  0x3f   : > { %s706_s22 = scalar_lea.vmem %s968_s8, 256  ;;  %s810_s26 = smov [#allocation5]  }
  0x40   : > { %p707_p2 = scmp.ne.s32.totalorder %s968_s8, %s706_s22  ;;  %s711_s7 = sshll.u32 %s810_s26, 4  ;;  %s712_s7 = int_to_ptr.vmem [resolvable:$false] %s711_s7 }
  0x41   : > { %s713_s14 = scalar_lea.vmem %s712_s7, 512  ;;  %p714_p8 = scmp.lt.s32.totalorder %s968_s8, %s712_s7 }
  0x42   : > { %p709_p9 = pnand %p707_p2, %p663_p5  ;;  %p715_p3 = scmp.lt.s32.totalorder %s713_s14, %s706_s22 }
  0x44   : > { %p710_p11 = pneg %p709_p9  ;;  %p716_p6 = por %p715_p3, %p714_p8 }
  0x46   : > { %p717_p4 = pnand %p716_p6, %p710_p11 }
  0x48   : > { %720 = shalt.err (!%p717_p4)
}
  0x49   : > { %s811_s12 = smov 128   ;;  %s812_s9 = smov 8  }
  0x4a   : > { %598 = dma.hbm_to_vmem [thread:$0]  (!%p921_p0), %s966_s6, 256, %s968_s8, %s211_s10, %s811_s12, %s811_s12, %s812_s9  }
  0x4b   : > { %234 = sbr.rel (%p957_p7) target bundleno = 545 (0x221), region = 36  ;;  %s999_s11 = sand.u32 (!%p957_p7), 1, %s791_s16  }
  0x4c   : > { %s556_s24 = sshll.u32 (!%p957_p7), %s999_s11, 3  ;;  %s237_s25 = scalar_lea.sflag (!%p957_p7), [#allocation3], %s999_s11 }
  0x4d   : > { %s240_s22 = scalar_lea.vmem (!%p957_p7), [#allocation2], %s556_s24  ;;  %p1093_p8 = scmp.ne.s32.totalorder (!%p957_p7), %s1086_s27, 0 }
  0x52   : > { %774 = dma.done.wait (%p1093_p8), %s237_s25, 128  }
  0x53   : > { %776 = vsyncadd (%p1093_p8), %s237_s25, 4294967168  ;;  %s557_s5 = sshll.u32 %s999_s11, 4  ;;  %s246_s13 = scalar_lea.sflag [#allocation6], %s999_s11 }
  0x54   : > { %s249_s21 = scalar_lea.vmem [#allocation5], %s557_s5 }
  0x55   : > { %778 = dma.done.wait (%p1093_p8), %s246_s13, 256  }
  0x56   : > { %780 = vsyncadd (%p1093_p8), %s246_s13, 4294967040  ;;  %v813_v0 = vmov 0.0   ;;  %vm814_vm0 = vmmov 0   ;;  %v659_v1 = vld [vmem:[%s1081_s3] sm:$0xff]   ;;  %vm298_vm1 = vcmask 130048   ;;  %vm356_vm2 = vcmask 1043456  }
  0x57   : > { %574 = vmatprep.subr.bf16.mxu0 %v813_v0  ;;  %576 = vmatprep.mubr.msk.bf16.mxu0 %vm814_vm0, %v813_v0  ;;  %v288_v2 = vld [vmem:[%s240_s22] sm:$0xff]  ;;  %vm352_vm3 = vcmask 64512   ;;  %v345_v11 = vld [vmem:[%s249_s21] sm:$0xff]  ;;  %s282_s26 = scalar_lea.vmem [#allocation7], %s557_s5  ;;  %s569_s14 = sshll.u32 %s799_s18, 8 }
  0x58   : > { %580 = vmatprep.subr.bf16.mxu1 %v813_v0  ;;  %582 = vmatprep.mubr.msk.bf16.mxu1 %vm814_vm0, %v813_v0  ;;  %v289_v3 = vpack.c.bf16 %v288_v2, %v288_v2  ;;  %v660_v10 = vld [vmem:[%s1080_s2] sm:$0xff]   ;;  %v346_v13 = vld [vmem:[%s249_s21 + $0x8] sm:$0xff]  ;;  %s422_s7 = sshll.u32 %s282_s26, 4  ;;  %s1029_s24 = scalar_lea.hbm %s1082_s4, %s569_s14  ;;  %s1024_s7 = int_to_ptr.vmem [resolvable:$true] %s422_s7 }
  0x59   : > { %575 = vmatpush3.bf16.msra.mxu0 %v659_v1  ;;  %s408_s25 = scalar_lea.sflag [#allocation4], %s999_s11  ;;  %s721_s22 = scalar_lea.vmem %s1024_s7, 256 }
  0x5a   : > { %p722_p0 = scmp.ne.s32.totalorder %s1024_s7, %s721_s22  ;;  %p1094_p5 = scmp.ne.s32.totalorder %s1087_s28, 0 }
  0x5b   : > { %s815_s18 = smov [#allocation7]  }
  0x5c   : > { %577 = vmatmul.mubr.msk.bf16.vlgmr.msra.gmra.mrb[0].mxu0 %vm298_vm1, %v289_v3  ;;  %p723_p7 = pnand %p722_p0, %p1094_p5  ;;  %s725_s5 = sshll.u32 %s815_s18, 4  ;;  %s726_s5 = int_to_ptr.vmem [resolvable:$false] %s725_s5 }
  0x5d   : > { %s727_s13 = scalar_lea.vmem %s726_s5, 512  ;;  %p728_p10 = scmp.lt.s32.totalorder %s1024_s7, %s726_s5 }
  0x5e   : > { %p724_p13 = pneg %p723_p7  ;;  %p729_p12 = scmp.lt.s32.totalorder %s727_s13, %s721_s22 }
  0x60   : > { %p730_p1 = por %p729_p12, %p728_p10 }
  0x62   : > { %p731_p2 = pnand %p730_p1, %p724_p13 }
 0x12f   : > { %v336_v4 = vpop.f32.mrb[0].mxu0 }
 0x130   : > { %v344_v5 = vpack.c.bf16 %v336_v4, %v336_v4  ;;  %v578_v6 = vpop.f32.mrb[1].mxu0 }
 0x131   : > { %v339_v7 = vpop.f32.mrb[2].mxu0 }
 0x132   : > { %v579_v8 = vpop.f32.mrb[3].mxu0  ;;  %v358_v9 = vsel %vm356_vm2, %v344_v5, 0 }
 0x133   : > { %581 = vmatpush3.bf16.msra.mxu1 %v358_v9 }
 0x136   : > { %583 = vmatmul.mubr.msk.bf16.vlgmr.msra.gmra.mrb[0].mxu1 %vm352_vm3, %v660_v10 }
 0x209   : > { %v394_v12 = vpop.f32.mrb[0].mxu1 }
 0x20a   : > { %v395_v14 = vadd.f32 %v394_v12, %v345_v11  ;;  %v584_v15 = vpop.f32.mrb[1].mxu1 }
 0x20b   : > { %v397_v16 = vpop.f32.mrb[2].mxu1 }
 0x20c   : > { %v401_v17 = vmax.f32 %v395_v14, 0.0  ;;  %v398_v18 = vadd.f32 %v397_v16, %v346_v13  ;;  %v585_v19 = vpop.f32.mrb[3].mxu1 }
 0x20e   : > { %v403_v20 = vmul.f32 192.0, %v401_v17  ;;  %v402_v21 = vmax.f32 %v398_v18, 0.0 }
 0x210   : > { %405 = vst [vmem:[%s282_s26] sm:$0xff] %v403_v20  ;;  %v404_v22 = vmul.f32 192.0, %v402_v21 }
 0x212   : > { %406 = vst [vmem:[%s282_s26 + $0x8] sm:$0xff] %v404_v22 }
 0x213   : > { %734 = shalt.err (!%p731_p2)
}
 0x214   : > { %s735_s21 = scalar_lea.hbm %s1029_s24, 256  ;;  %s739_s27 = scalar_lea.hbm %s1082_s4, 512 }
 0x215   : > { %p736_p9 = scmp.ne.s32.totalorder %s1029_s24, %s735_s21  ;;  %p740_p6 = scmp.lt.u32.totalorder %s1029_s24, %s1082_s4 }
 0x216   : > { %p741_p4 = scmp.lt.u32.totalorder %s739_s27, %s735_s21  ;;  %p743_p0 = scmp.lt.u32.totalorder %s735_s21, %s1029_s24 }
 0x217   : > { %p737_p11 = pnand %p736_p9, %p1094_p5 }
 0x218   : > { %p742_p8 = por %p741_p4, %p740_p6 }
 0x219   : > { %p738_p3 = pneg %p737_p11 }
 0x21a   : > { %p744_p7 = por %p743_p0, %p742_p8 }
 0x21c   : > { %p745_p13 = pnand %p744_p7, %p738_p3 }
 0x21e   : > { %748 = shalt.err (!%p745_p13)
}
 0x21f   : > { %s816_s14 = smov 128   ;;  %s817_s12 = smov 8  }
 0x220   : > { %590 = dma.vmem_to_hbm [thread:$0]  (%p1094_p5), %s1024_s7, 256, %s1029_s24, %s408_s25, %s816_s14, %s816_s14, %s817_s12  }
 0x221 PF: > { %s437_s9 = sand.u32 1, %s787_s15   ;;  %p1095_p10 = scmp.ne.s32.totalorder %s1088_s30, 0 }
 0x222   : > { %p1096_p12 = scmp.ge.s32.totalorder %s807_s20, 2  ;;  %s438_s22 = scalar_lea.sflag [#allocation4], %s437_s9 }
 0x224   : > { %p600_p1 = pnand %p1096_p12, %p1095_p10 }
 0x226   : > { %782 = dma.done.wait (!%p600_p1), %s438_s22, 256  }
 0x227   : > { %784 = vsyncadd (!%p600_p1), %s438_s22, 4294967040  ;;  %s23_s20 = sadd.s32 1, %s807_s20   ;;  %s1097_s15 = smov %s791_s16 }
 0x228   : > { %p20_p2 = scmp.ge.s32.totalorder %s23_s20, 4   ;;  %s1098_s16 = smov %s795_s17 }
 0x229   : > { %s1099_s17 = smov %s899_s29  ;;  %s1100_s18 = smov %s803_s19 }
 0x22a   : > { %s1101_s19 = smov %s1103_s23  ;;  %22 = sbr.rel (!%p20_p2) target bundleno = 8 (0x8), region = 97 }
 0x231   :  { %443 = vsyncpa [#allocation3], 1 }
 0x232   :  { %445 = vsyncpa [#allocation3 + $0x1], 1 }
 0x233   :  { %446 = vsyncpa [#allocation6], 1 }
 0x234   :  { %448 = vsyncpa [#allocation6 + $0x1], 1 }
 0x235   :  { %449 = vsyncpa [#allocation4], 1 }
 0x236   :  { %451 = vsyncpa [#allocation4 + $0x1], 1 }

</bundles_post_ra>
